<compile_context>
chip_gen: v5e
topology: v5e:2x2
jax: 0.10.0
libtpu: 0.0.40
codegen_flags: <defaults>
</compile_context>

<pallas_src>
import functools

import jax
import jax.numpy as jnp
from jax.experimental import pallas as pl
from jax.experimental.pallas import tpu as pltpu


def _round_up(n, m):
    return ((n + m - 1) // m) * m


def _netmlp_kernel(x_ref, w_ref, b_ref, o_ref, *, num_classes):
    # x: (TILE_B, F) input dtype; w: (F, C_PAD) input dtype; b: (1, C_PAD) f32
    # o: (TILE_B, C) f32
    y = jnp.dot(x_ref[...], w_ref[...], preferred_element_type=jnp.float32)
    y = y + b_ref[...]
    y = jnp.maximum(y, 0.0)

    # Mask padded class lanes out of the log_softmax. The -1e30 fill removes them
    # from the max, and exp(-1e30 - m) underflows to exactly 0, so no second
    # where() is needed around the exp-sum.
    lane = jax.lax.broadcasted_iota(jnp.int32, y.shape, dimension=1)
    y = jnp.where(lane < num_classes, y, -1e30)

    m = jnp.max(y, axis=-1, keepdims=True)
    z = y - m
    s = jnp.sum(jnp.exp(z), axis=-1, keepdims=True)
    out = z - jnp.log(s)
    o_ref[...] = out[:, : o_ref.shape[1]].astype(o_ref.dtype)


def prepare_netmlp_params(weight, bias, x_dtype):
    """Call-once (hoisted) param prep: transpose + lane-pad the Linear params.

    weight: (C, F) torch.nn.Linear layout; bias: (C,).
    Returns (w_pad: (F, C_PAD) in x_dtype, b_pad: (1, C_PAD) f32).
    """
    C, F_ = weight.shape
    C_PAD = _round_up(C, 128)
    w_pad = jnp.zeros((F_, C_PAD), x_dtype).at[:, :C].set(
        jnp.transpose(weight).astype(x_dtype))
    b_pad = jnp.zeros((1, C_PAD), jnp.float32).at[0, :C].set(
        bias.astype(jnp.float32))
    return w_pad, b_pad


def _select_tile_b(B, F_, itemsize, tile_b):
    # Packed-sublane multiple for the (TILE_B, F) input block.
    mult = max(8, 32 // itemsize)        # 8 for f32, 16 for bf16, 32 for int8
    # Keep the grid at >= 2 steps for large B (both v7x TensorCores get work,
    # and the last tile is better balanced).
    t = min(tile_b, _round_up(pl.cdiv(B, 2), mult))
    # VMEM cap: double-buffered x tile + double-buffered (lane-padded) out tile.
    bytes_per_row = 2 * F_ * itemsize + 2 * 128 * 4
    cap = (24 * 1024 * 1024) // bytes_per_row
    t = min(t, cap)
    return max(mult, (t // mult) * mult)


def netmlp_forward(x, w_pad, b_pad, num_classes, *, tile_b=4096):
    """x: (B, ...) any shape; w_pad/b_pad from prepare_netmlp_params."""
    B = x.shape[0]
    x2 = x.reshape(B, -1)                      # flatten, like x.view(B, -1)
    F_ = x2.shape[1]
    C_PAD = w_pad.shape[1]
    assert w_pad.shape == (F_, C_PAD)

    TILE_B = _select_tile_b(B, F_, x2.dtype.itemsize, tile_b)
    grid = (pl.cdiv(B, TILE_B),)               # ragged last block handled by Pallas

    # Explicit VMEM limit only when a generic-F tile budget outgrows the default
    # 32 MiB scoped limit (weight block stays VMEM-resident across the grid).
    vmem_est = (2 * TILE_B * F_ * x2.dtype.itemsize        # x double buffer
                + 2 * TILE_B * 128 * 4                     # out (lane-padded) double buffer
                + 2 * F_ * C_PAD * w_pad.dtype.itemsize    # weight
                + 2 * C_PAD * 4)                           # bias
    vmem_limit = int(vmem_est * 1.2) if vmem_est > 30 * 1024 * 1024 else None

    return pl.pallas_call(
        functools.partial(_netmlp_kernel, num_classes=num_classes),
        out_shape=jax.ShapeDtypeStruct((B, num_classes), jnp.float32),
        grid=grid,
        in_specs=[
            pl.BlockSpec((TILE_B, F_), lambda i: (i, 0)),   # streamed per batch tile
            pl.BlockSpec((F_, C_PAD), lambda i: (0, 0)),    # weight: VMEM-resident
            pl.BlockSpec((1, C_PAD), lambda i: (0, 0)),     # bias:   VMEM-resident
        ],
        out_specs=pl.BlockSpec((TILE_B, num_classes), lambda i: (i, 0)),
        compiler_params=pltpu.CompilerParams(
            dimension_semantics=("parallel",),
            vmem_limit_bytes=vmem_limit),
    )(x2, w_pad, b_pad)


def reference_forward(x, weight, bias):
    B = x.shape[0]
    x2 = x.reshape(B, -1).astype(jnp.float32)
    y = x2 @ weight.T.astype(jnp.float32) + bias.astype(jnp.float32)
    y = jnp.maximum(y, 0.0)
    return jax.nn.log_softmax(y, axis=1)


if __name__ == "__main__":
    key = jax.random.PRNGKey(0)
    k_x, k_w, k_b = jax.random.split(key, 3)

    # Shapes consistent with NetMLP: x (B, 2, 4, 4) -> flatten -> sh = 32, c = 6.
    B, C_in, H, W = 8, 2, 4, 4
    sh = C_in * H * W          # 32
    c_out = 6                  # fixed in NetMLP.__init__

    x = jax.random.normal(k_x, (B, C_in, H, W), dtype=jnp.float32)

    bound = 1.0 / (sh ** 0.5)
    weight = jax.random.uniform(k_w, (c_out, sh), minval=-bound, maxval=bound,
                                dtype=jnp.float32)
    bias = jax.random.uniform(k_b, (c_out,), minval=-bound, maxval=bound,
                              dtype=jnp.float32)

    # Param prep hoisted out of the per-call path (do once, reuse every call).
    w_pad, b_pad = prepare_netmlp_params(weight, bias, x.dtype)

    out = netmlp_forward(x, w_pad, b_pad, c_out)
    out = jax.block_until_ready(out)

    ref = reference_forward(x, weight, bias)
    assert out.shape == (B, c_out)
    assert jnp.allclose(out, ref, atol=1e-5, rtol=1e-5), "mismatch vs reference"

    print("KERNEL_OK")
</pallas_src>

<mosaic_0001>
module attributes {stable_mosaic.version = 11 : i64} {
  func.func @_netmlp_kernel(%arg0: i32, %arg1: memref<8x32xf32, #tpu.memory_space<vmem>>, %arg2: memref<32x128xf32, #tpu.memory_space<vmem>>, %arg3: memref<1x128xf32, #tpu.memory_space<vmem>>, %arg4: memref<8x6xf32, #tpu.memory_space<vmem>>) attributes {dimension_semantics = [#tpu.dimension_semantics<parallel>], iteration_bounds = array<i64: 1>, scalar_prefetch = 0 : i64, scratch_operands = 0 : i64, tpu.core_type = #tpu.core_type<tc>, window_params = [{transform_indices = @transform_0, window_bounds = array<i64: 8, 32>}, {pipeline_mode = #tpu.pipeline_mode<synchronous>, transform_indices = @transform_1, window_bounds = array<i64: 32, 128>}, {pipeline_mode = #tpu.pipeline_mode<synchronous>, transform_indices = @transform_2, window_bounds = array<i64: 1, 128>}, {transform_indices = @transform_3, window_bounds = array<i64: 8, 6>}]} {
    %c0 = arith.constant 0 : index
    %c0_0 = arith.constant 0 : index
    %0 = vector.load %arg1[%c0, %c0_0] : memref<8x32xf32, #tpu.memory_space<vmem>>, vector<8x32xf32>
    %c0_1 = arith.constant 0 : index
    %c0_2 = arith.constant 0 : index
    %1 = vector.load %arg2[%c0_1, %c0_2] : memref<32x128xf32, #tpu.memory_space<vmem>>, vector<32x128xf32>
    %cst = arith.constant dense<0.000000e+00> : vector<8x128xf32>
    %2 = tpu.matmul %0, %1, %cst {dimension_numbers = #tpu.dot_dimension_numbers<[1], [0], [0], [1], [0, 0, 1, 1], [], []>} : vector<8x32xf32>, vector<32x128xf32>, vector<8x128xf32> -> vector<8x128xf32>
    %c0_3 = arith.constant 0 : index
    %c0_4 = arith.constant 0 : index
    %3 = vector.load %arg3[%c0_3, %c0_4] : memref<1x128xf32, #tpu.memory_space<vmem>>, vector<1x128xf32>
    %4 = vector.broadcast %3 : vector<1x128xf32> to vector<8x128xf32>
    %5 = arith.addf %2, %4 : vector<8x128xf32>
    %cst_5 = arith.constant 0.000000e+00 : f32
    %6 = vector.broadcast %cst_5 : f32 to vector<8x128xf32>
    %7 = arith.maximumf %5, %6 : vector<8x128xf32>
    %8 = tpu.iota {dimensions = array<i32: 1>} : vector<8x128xi32>
    %c6_i32 = arith.constant 6 : i32
    %9 = vector.broadcast %c6_i32 : i32 to vector<8x128xi32>
    %10 = arith.cmpi slt, %8, %9 : vector<8x128xi32>
    %cst_6 = arith.constant -1.000000e+30 : f32
    %11 = vector.broadcast %cst_6 : f32 to vector<8x128xf32>
    %12 = arith.select %10, %7, %11 : vector<8x128xi1>, vector<8x128xf32>
    %cst_7 = arith.constant dense<0xFF800000> : vector<8xf32>
    %13 = vector.multi_reduction <maximumf>, %12, %cst_7 [1] : vector<8x128xf32> to vector<8xf32>
    %14 = vector.shape_cast %13 : vector<8xf32> to vector<8x1xf32>
    %15 = vector.broadcast %14 : vector<8x1xf32> to vector<8x128xf32>
    %16 = arith.subf %12, %15 : vector<8x128xf32>
    %17 = math.exp %16 : vector<8x128xf32>
    %cst_8 = arith.constant dense<0.000000e+00> : vector<8xf32>
    %18 = vector.multi_reduction <add>, %17, %cst_8 [1] : vector<8x128xf32> to vector<8xf32>
    %19 = vector.shape_cast %18 : vector<8xf32> to vector<8x1xf32>
    %20 = math.log %19 : vector<8x1xf32>
    %21 = vector.broadcast %20 : vector<8x1xf32> to vector<8x128xf32>
    %22 = arith.subf %16, %21 : vector<8x128xf32>
    %23 = vector.extract_strided_slice %22 {offsets = [0, 0], sizes = [8, 6], strides = [1, 1]} : vector<8x128xf32> to vector<8x6xf32>
    %c0_9 = arith.constant 0 : index
    %c0_10 = arith.constant 0 : index
    %24 = vector.load %arg4[%c0_9, %c0_10] : memref<8x6xf32, #tpu.memory_space<vmem>>, vector<8x6xf32>
    tpu.vector_store %arg4[%c0_9, %c0_10], %23 {strides = array<i32>} : memref<8x6xf32, #tpu.memory_space<vmem>>, vector<8x6xf32>,
    return
  }
  func.func @transform_0(%arg0: i32) -> (i32, i32) {
    %c0_i32 = arith.constant 0 : i32
    %c0_i32_0 = arith.constant 0 : i32
    return %arg0, %c0_i32 : i32, i32
  }
  func.func @transform_1(%arg0: i32) -> (i32, i32) {
    %c0_i32 = arith.constant 0 : i32
    %c0_i32_0 = arith.constant 0 : i32
    %c0_i32_1 = arith.constant 0 : i32
    return %c0_i32, %c0_i32_0 : i32, i32
  }
  func.func @transform_2(%arg0: i32) -> (i32, i32) {
    %c0_i32 = arith.constant 0 : i32
    %c0_i32_0 = arith.constant 0 : i32
    %c0_i32_1 = arith.constant 0 : i32
    return %c0_i32, %c0_i32_0 : i32, i32
  }
  func.func @transform_3(%arg0: i32) -> (i32, i32) {
    %c0_i32 = arith.constant 0 : i32
    %c0_i32_0 = arith.constant 0 : i32
    return %arg0, %c0_i32 : i32, i32
  }
}

</mosaic_0001>

<bundles_post_ra>
// kernel: tpu_custom_call.1
= control target key start
LH: loop header
LB: loop body
LE: loop exit
PB: predicated region body
PF: predicated region fallthrough
CT: control target
= control target key end

     0   :  { %8 = vsyncpa [#allocation3], 0  ;;  %s239_s0 = inlined_call_operand.hbm [shape: f32[8,32], index: 0, kind: input, shape index: {}]   ;;  %s240_s1 = inlined_call_operand.hbm [shape: f32[32,128], index: 1, kind: input, shape index: {}]   ;;  %s241_s2 = inlined_call_operand.vmem [shape: f32[1,128], index: 2, kind: input, shape index: {}]   ;;  %s242_s3 = inlined_call_operand.hbm [shape: f32[8,6], index: 3, kind: output, shape index: {}]  }
   0x1   :  { %9 = vsyncpa [#allocation6], 0 }
   0x2   :  { %10 = vsyncpa [#allocation4], 0  ;;  %s16_s14 = sshll.u32 %s239_s0, 4  ;;  %s202_s15 = smov [#allocation2]   ;;  %s17_s14 = int_to_ptr.hbm [resolvable:$true] %s16_s14 }
   0x3   :  { %s18_s16 = sshll.u32 %s202_s15, 4  ;;  %s26_s19 = sshll.u32 %s240_s1, 4  ;;  %s19_s16 = int_to_ptr.vmem [resolvable:$true] %s18_s16  ;;  %s27_s19 = int_to_ptr.hbm [resolvable:$true] %s26_s19 }
   0x4   :  { %21 = dma.hbm_to_vmem [thread:$0]  %s17_s14, 128, %s19_s16, [#allocation3]  }
   0x5   :  { %s203_s20 = smov [#allocation5]   ;;  %s204_s22 = smov 128  }
   0x6   :  { %s28_s21 = sshll.u32 %s203_s20, 4  ;;  %s205_s23 = smov 8   ;;  %s29_s21 = int_to_ptr.vmem [resolvable:$true] %s28_s21 }
   0x7   :  { %34 = dma.hbm_to_vmem [thread:$0]  %s27_s19, 512, %s29_s21, [#allocation6], %s204_s22, %s204_s22, %s205_s23  }
   0x8   :  { %196 = dma.done.wait [#allocation3], 128  }
   0x9   :  { %197 = vsyncadd [#allocation3], 4294967168 }
   0xa   :  { %198 = dma.done.wait [#allocation6], 512  }
   0xb   :  { %199 = vsyncadd [#allocation6], 4294966784  ;;  %v49_v0 = vld [vmem:[#allocation5 + $0x18] sm:$0xff]  ;;  %v48_v1 = vld [vmem:[#allocation5 + $0x10] sm:$0xff]  ;;  %vm54_vm0 = vcmask 261120   ;;  %v79_v5 = vlaneseq  ;;  %s206_s24 = smov [#allocation7]  }
   0xc   :  { %70 = vmatpush.msra.mxu0 %v49_v0  ;;  %v47_v2 = vld [vmem:[#allocation5 + $0x8] sm:$0xff]  ;;  %v46_v3 = vld [vmem:[#allocation5] sm:$0xff]  ;;  %v45_v4 = vld [vmem:[#allocation2] sm:$0xff]  ;;  %s100_s25 = sshll.u32 %s206_s24, 4  ;;  %s102_s27 = sshll.u32 %s242_s3, 4  ;;  %vm93_vm2 = vcmask 48128   ;;  %s101_s25 = int_to_ptr.vmem [resolvable:$true] %s100_s25  ;;  %s103_s27 = int_to_ptr.hbm [resolvable:$true] %s102_s27 }
   0xd   :  { %v119_v6 = vld [vmem:[%s241_s2] ss:$0 sm:$0xff]  ;;  %v80_v7 = vand.u32 127, %v79_v5 }
   0xe   :  { %71 = vmatpush.msra.mxu0 %v48_v1 }
   0xf   :  { %vm81_vm1 = vcmp.lt.s32.totalorder %v80_v7, 6 }
  0x10   :  { %72 = vmatpush.msra.mxu0 %v47_v2 }
  0x12   :  { %73 = vmatpush.msra.mxu0 %v46_v3 }
  0x13   :  { %113 = vmatmul.msk.f32.vlgmr.msra.gmra.mxu0 %vm54_vm0, %v45_v4 }
  0x90   :  { %v75_v8 = vpop.f32.mrf.mxu0 }
  0x91   :  { %v76_v9 = vadd.f32 %v119_v6, %v75_v8 }
  0x93   :  { %v78_v10 = vmax.f32 %v76_v9, 0.0 }
  0x95   :  { %v82_v11 = vsel %vm81_vm1, %v78_v10, -1e+30 }
  0x96   :  { %83 = vmax.xlane.f32.xlu0 %v82_v11 }
 0x109   :  { %v84_v12 = vpop.xlane.xlu0 %83 }
 0x10a   :  { %v85_v13 = vsub.f32 %v82_v11, %v84_v12 }
 0x10c   :  { %v86_v14 = vmul.f32 1.442695, %v85_v13 }
 0x10e   :  { %120 = vpow2.f32 %v86_v14 }
 0x114   :  { %v121_v15 = vpop.eup %120 }
 0x115   :  { %88 = vadd.xlane.f32.xlu0 %v121_v15 }
 0x188   :  { %v89_v16 = vpop.xlane.xlu0 %88 }
 0x189   :  { %122 = vlog2.f32 %v89_v16 }
 0x18f   :  { %v123_v17 = vpop.eup %122 }
 0x190   :  { %v91_v18 = vmul.f32 0.6931472, %v123_v17 }
 0x192   :  { %v92_v19 = vsub.f32 %v85_v13, %v91_v18 }
 0x194   :  { %94 = vst.msk [vmem:[#allocation7] sm:$0xff] %vm93_vm2, %v92_v19 }
 0x195   :  { %105 = dma.vmem_to_hbm [thread:$0]  %s101_s25, 128, %s103_s27, [#allocation4]  }
 0x196   :  { %200 = dma.done.wait [#allocation4], 128  }
 0x197   :  { %201 = vsyncadd [#allocation4], 4294967168 }
 0x198   :  { %110 = vsyncpa [#allocation3], 1 }
 0x199   :  { %111 = vsyncpa [#allocation6], 1 }
 0x19a   :  { %112 = vsyncpa [#allocation4], 1 }

</bundles_post_ra>
